<compile_context>
chip_gen: v7x
topology: tpu7x:2x2x1
jax: 0.10.0
libtpu: 0.0.40
codegen_flags: <defaults>
</compile_context>

<pallas_src>
import itertools
import numpy as np

import jax
import jax.numpy as jnp
from jax.experimental import pallas as pl
from jax.experimental.pallas import tpu as pltpu


# ---------------------------------------------------------------------------
# Matcher cost weights (module __init__ params; deterministic, no checkpoint)
# ---------------------------------------------------------------------------
COST_CLASS = 2.0
COST_BBOX = 5.0
COST_GIOU = 2.0
COST_RAD = 4.0

ALPHA = 0.25
GAMMA = 2.0
EPS = 1e-8


def _round_up(x, m):
    return (x + m - 1) // m * m


def _pow_gamma(x):
    # Keep exact semantics for the default GAMMA=2 (cheap square) while staying
    # correct if GAMMA is ever changed.
    if GAMMA == 2.0:
        return x * x
    return x ** GAMMA


# ---------------------------------------------------------------------------
# Pallas kernel: per-(batch, Q-tile) transposed pairwise cost block (T, TQ)
# ---------------------------------------------------------------------------
def _cost_kernel(logits_ref, pred_ref, tgt_ref, onehot_ref, c_ref):
    logits = logits_ref[0]    # (NCLS_p, TQ)  raw logits, class on sublane, query on lane
    pred = pred_ref[0]        # (7, TQ)       cx cy cz l w h rad
    tgt = tgt_ref[0]          # (T_p, 7)      targets on sublane
    onehot = onehot_ref[0]    # (T_p, NCLS_p) one-hot labels

    # --- focal-style classification cost ---
    # sigmoid + log ride the EUP slot; the tiny gather is a one-hot MXU matmul.
    prob = jax.nn.sigmoid(logits)
    one_m_p = 1.0 - prob
    neg = (1.0 - ALPHA) * _pow_gamma(prob) * (-jnp.log(one_m_p + EPS))
    pos = ALPHA * _pow_gamma(one_m_p) * (-jnp.log(prob + EPS))
    acc = COST_CLASS * jnp.dot(onehot, pos - neg,
                               preferred_element_type=jnp.float32)   # (T_p, TQ)

    # --- L1 cdist on box centers/sizes (6 dims) and heading, fused in ---
    for d in range(6):
        acc = acc + COST_BBOX * jnp.abs(tgt[:, d:d + 1] - pred[d:d + 1, :])
    acc = acc + COST_RAD * jnp.abs(tgt[:, 6:7] - pred[6:7, :])

    # --- 3-D generalized IoU (cxcyczlwh -> per-axis intervals on the fly) ---
    inter = None
    enclose = None
    for d in range(3):
        p_c = pred[d:d + 1, :]          # (1, TQ)
        p_s = pred[d + 3:d + 4, :]
        t_c = tgt[:, d:d + 1]           # (T_p, 1)
        t_s = tgt[:, d + 3:d + 4]
        p_lo = p_c - 0.5 * p_s
        p_hi = p_c + 0.5 * p_s
        t_lo = t_c - 0.5 * t_s
        t_hi = t_c + 0.5 * t_s
        i_d = jnp.maximum(jnp.minimum(p_hi, t_hi) - jnp.maximum(p_lo, t_lo), 0.0)
        e_d = jnp.maximum(p_hi, t_hi) - jnp.minimum(p_lo, t_lo)  # >= 0 for valid boxes
        inter = i_d if inter is None else inter * i_d
        enclose = e_d if enclose is None else enclose * e_d

    vol_p = pred[3:4, :] * pred[4:5, :] * pred[5:6, :]            # (1, TQ)
    vol_t = tgt[:, 3:4] * tgt[:, 4:5] * tgt[:, 5:6]               # (T_p, 1)
    union = vol_p + vol_t - inter
    inv_union = pl.reciprocal(union, approx=True)                 # EUP
    inv_enclose = pl.reciprocal(enclose, approx=True)             # EUP
    giou = inter * inv_union - (enclose - union) * inv_enclose
    acc = acc + COST_GIOU * (-giou)

    c_ref[0] = acc


def compute_cost_matrices(pred_logits, pred_boxes, tgt_pad, onehot_pad):
    """Returns transposed cost C_t of shape (bs, T_p, Q_p).

    tgt_pad    : (bs, T_p, 7)       padded targets (dummy unit boxes in padding)
    onehot_pad : (bs, T_p, NCLS_p)  one-hot labels (all-zero rows for padding)
    """
    bs, Q, ncls = pred_logits.shape
    T_p = tgt_pad.shape[1]
    ncls_p = onehot_pad.shape[2]

    Q_p = _round_up(Q, 128)
    TQ = 256 if Q_p % 256 == 0 else 128        # Q-tile: caps per-step VMEM

    # Layout plumbing (wrapper-side transpose/pad for lane-dense kernel layout).
    logits = jnp.asarray(pred_logits, jnp.float32)
    logits = jnp.pad(logits, ((0, 0), (0, Q_p - Q), (0, ncls_p - ncls)))
    logits_t = logits.transpose(0, 2, 1)       # (bs, NCLS_p, Q_p)

    boxes = jnp.asarray(pred_boxes, jnp.float32)
    boxes = jnp.pad(boxes, ((0, 0), (0, Q_p - Q), (0, 0)))
    pred_t = boxes.transpose(0, 2, 1)          # (bs, 7, Q_p)

    grid = (bs, Q_p // TQ)
    return pl.pallas_call(
        _cost_kernel,
        out_shape=jax.ShapeDtypeStruct((bs, T_p, Q_p), jnp.float32),
        grid=grid,
        in_specs=[
            pl.BlockSpec((1, ncls_p, TQ), lambda b, q: (b, 0, q)),
            pl.BlockSpec((1, 7, TQ), lambda b, q: (b, 0, q)),
            pl.BlockSpec((1, T_p, 7), lambda b, q: (b, 0, 0)),
            pl.BlockSpec((1, T_p, ncls_p), lambda b, q: (b, 0, 0)),
        ],
        out_specs=pl.BlockSpec((1, T_p, TQ), lambda b, q: (b, 0, q)),
        compiler_params=pltpu.CompilerParams(
            dimension_semantics=("parallel", "parallel"),
            vmem_limit_bytes=32 * 1024 * 1024),
    )(logits_t, pred_t, tgt_pad, onehot_pad)


# ---------------------------------------------------------------------------
# Pure-JAX reference of one batch element (for correctness check)
# ---------------------------------------------------------------------------
def _cost_ref(logits, boxes, tids, tboxes):
    prob = jax.nn.sigmoid(logits).astype(jnp.float32)
    bbox, rad = boxes[:, :6].astype(jnp.float32), boxes[:, 6:].astype(jnp.float32)
    tbbox, trad = tboxes[:, :6].astype(jnp.float32), tboxes[:, 6:].astype(jnp.float32)

    neg = (1 - ALPHA) * prob ** GAMMA * (-jnp.log(1 - prob + EPS))
    pos = ALPHA * (1 - prob) ** GAMMA * (-jnp.log(prob + EPS))
    cost_class = pos[:, tids] - neg[:, tids]

    cost_bbox = jnp.abs(bbox[:, None, :] - tbbox[None, :, :]).sum(-1)
    cost_rad = jnp.abs(rad[:, None, :] - trad[None, :, :]).sum(-1)

    def corners(b):
        return jnp.concatenate([b[:, :3] - 0.5 * b[:, 3:], b[:, :3] + 0.5 * b[:, 3:]], -1)

    b1, b2 = corners(bbox), corners(tbbox)
    vol1 = jnp.prod(b1[:, 3:] - b1[:, :3], -1)
    vol2 = jnp.prod(b2[:, 3:] - b2[:, :3], -1)
    lt = jnp.maximum(b1[:, None, :3], b2[None, :, :3])
    rb = jnp.minimum(b1[:, None, 3:], b2[None, :, 3:])
    inter = jnp.prod(jnp.clip(rb - lt, 0.0), -1)
    union = vol1[:, None] + vol2[None, :] - inter
    iou = inter / union
    lte = jnp.minimum(b1[:, None, :3], b2[None, :, :3])
    rbe = jnp.maximum(b1[:, None, 3:], b2[None, :, 3:])
    vole = jnp.prod(jnp.clip(rbe - lte, 0.0), -1)
    giou = iou - (vole - union) / vole

    return (COST_BBOX * cost_bbox + COST_CLASS * cost_class
            + COST_GIOU * (-giou) + COST_RAD * cost_rad)


# ---------------------------------------------------------------------------
# Host-side Hungarian assignment
# TODO(synk): sequential Hungarian (linear_sum_assignment) has no clean Pallas
# equivalent; exact brute force here is fine for toy sizes only — use
# scipy / Jonker-Volgenant for realistic target counts.
# ---------------------------------------------------------------------------
def linear_sum_assignment_small(cost):
    cost = np.asarray(cost, dtype=np.float64)
    r, c = cost.shape
    transposed = False
    if r < c:
        cost, transposed = cost.T, True
        r, c = cost.shape
    best_val, best_rows = None, None
    for rows in itertools.permutations(range(r), c):
        val = sum(cost[rows[j], j] for j in range(c))
        if best_val is None or val < best_val:
            best_val, best_rows = val, rows
    row_ind = np.array(best_rows, dtype=np.int64)
    col_ind = np.arange(c, dtype=np.int64)
    if transposed:
        row_ind, col_ind = col_ind, row_ind
    order = np.argsort(row_ind)
    return row_ind[order], col_ind[order]


def hungarian_matcher_3d(outputs, targets, num_classes):
    """Mirrors HungarianMatcher3d.forward. outputs: dict of jnp arrays;
    targets: list of dicts with 'labels' (T_i,) int32 and 'boxes' (T_i, 7)."""
    bs, Q = outputs["pred_logits"].shape[:2]
    t_lens = [int(t["labels"].shape[0]) for t in targets]
    T_max = max(t_lens)
    T_p = _round_up(max(T_max, 1), 8)
    ncls_p = _round_up(num_classes, 8)

    # pad targets to T_p (padded rows sliced off before assignment)
    tgt = np.zeros((bs, T_p, 7), np.float32)
    tgt[..., 3:6] = 1.0  # dummy unit boxes (avoid div-by-zero in GIoU)
    oh = np.zeros((bs, T_p, ncls_p), np.float32)
    for i, t in enumerate(targets):
        n = t_lens[i]
        boxes = np.asarray(t["boxes"], np.float32)
        labels = np.asarray(t["labels"], np.int64)
        tgt[i, :n] = boxes
        oh[i, np.arange(n), labels] = 1.0

    C_t = compute_cost_matrices(
        outputs["pred_logits"], outputs["pred_boxes"],
        jnp.asarray(tgt), jnp.asarray(oh))
    C_t = np.asarray(jax.block_until_ready(C_t))   # (bs, T_p, Q_p)

    indices = [
        linear_sum_assignment_small(C_t[i, :t_lens[i], :Q].T)
        for i in range(bs)
    ]
    return indices, C_t


# ---------------------------------------------------------------------------
# main
# ---------------------------------------------------------------------------
if __name__ == "__main__":
    key = jax.random.PRNGKey(0)
    bs, Q, NCLS = 2, 8, 4
    t_lens = [3, 5]

    k1, k2, k3, k4, k5, k6 = jax.random.split(key, 6)
    pred_logits = jax.random.normal(k1, (bs, Q, NCLS), jnp.float32)
    centers = jax.random.uniform(k2, (bs, Q, 3), jnp.float32)
    sizes = jax.random.uniform(k3, (bs, Q, 3), jnp.float32, minval=0.2, maxval=1.0)
    rads = jax.random.uniform(k4, (bs, Q, 1), jnp.float32)
    pred_boxes = jnp.concatenate([centers, sizes, rads], axis=-1)  # (bs, Q, 7)

    targets = []
    tkeys = jax.random.split(k5, bs)
    lkeys = jax.random.split(k6, bs)
    for i in range(bs):
        n = t_lens[i]
        tc = jax.random.uniform(tkeys[i], (n, 3), jnp.float32)
        ts = jax.random.uniform(jax.random.fold_in(tkeys[i], 1), (n, 3),
                                jnp.float32, minval=0.2, maxval=1.0)
        trd = jax.random.uniform(jax.random.fold_in(tkeys[i], 2), (n, 1), jnp.float32)
        labels = jax.random.randint(lkeys[i], (n,), 0, NCLS, jnp.int32)
        targets.append({"labels": labels,
                        "boxes": jnp.concatenate([tc, ts, trd], axis=-1)})

    outputs = {"pred_logits": pred_logits, "pred_boxes": pred_boxes}
    indices, C_t = hungarian_matcher_3d(outputs, targets, NCLS)

    # correctness check against pure-JAX reference (per real target count).
    # tolerance relaxed slightly vs exact math because GIoU uses approx
    # EUP reciprocals inside the kernel.
    for b in range(bs):
        ref = np.asarray(_cost_ref(pred_logits[b], pred_boxes[b],
                                   np.asarray(targets[b]["labels"]),
                                   targets[b]["boxes"]))
        got = C_t[b, :t_lens[b], :Q].T          # back to (Q, T_b) orientation
        np.testing.assert_allclose(got, ref, rtol=1e-2, atol=1e-2)

    for b, (i, j) in enumerate(indices):
        assert i.dtype == np.int64 and j.dtype == np.int64
        assert len(i) == len(j) == min(Q, t_lens[b])

    print("KERNEL_OK")
</pallas_src>

<mosaic_0001>
module attributes {stable_mosaic.version = 11 : i64} {
  func.func @_cost_kernel(%arg0: i32, %arg1: i32, %arg2: memref<1x8x128xf32, #tpu.memory_space<vmem>>, %arg3: memref<1x7x128xf32, #tpu.memory_space<vmem>>, %arg4: memref<1x8x7xf32, #tpu.memory_space<vmem>>, %arg5: memref<1x8x8xf32, #tpu.memory_space<vmem>>, %arg6: memref<1x8x128xf32, #tpu.memory_space<vmem>>) attributes {dimension_semantics = [#tpu.dimension_semantics<parallel>, #tpu.dimension_semantics<parallel>], iteration_bounds = array<i64: 2, 1>, scalar_prefetch = 0 : i64, scratch_operands = 0 : i64, tpu.core_type = #tpu.core_type<tc>, window_params = [{transform_indices = @transform_0, window_bounds = array<i64: 1, 8, 128>}, {transform_indices = @transform_1, window_bounds = array<i64: 1, 7, 128>}, {transform_indices = @transform_2, window_bounds = array<i64: 1, 8, 7>}, {transform_indices = @transform_3, window_bounds = array<i64: 1, 8, 8>}, {transform_indices = @transform_4, window_bounds = array<i64: 1, 8, 128>}]} {
    %c0 = arith.constant 0 : index
    %c0_0 = arith.constant 0 : index
    %c0_1 = arith.constant 0 : index
    %0 = vector.load %arg2[%c0, %c0_0, %c0_1] : memref<1x8x128xf32, #tpu.memory_space<vmem>>, vector<1x8x128xf32>
    %1 = vector.shape_cast %0 : vector<1x8x128xf32> to vector<8x128xf32>
    %c0_2 = arith.constant 0 : index
    %c0_3 = arith.constant 0 : index
    %c0_4 = arith.constant 0 : index
    %2 = vector.load %arg3[%c0_2, %c0_3, %c0_4] : memref<1x7x128xf32, #tpu.memory_space<vmem>>, vector<1x7x128xf32>
    %3 = vector.shape_cast %2 : vector<1x7x128xf32> to vector<7x128xf32>
    %c0_5 = arith.constant 0 : index
    %c0_6 = arith.constant 0 : index
    %c0_7 = arith.constant 0 : index
    %4 = vector.load %arg4[%c0_5, %c0_6, %c0_7] : memref<1x8x7xf32, #tpu.memory_space<vmem>>, vector<1x8x7xf32>
    %5 = vector.shape_cast %4 : vector<1x8x7xf32> to vector<8x7xf32>
    %c0_8 = arith.constant 0 : index
    %c0_9 = arith.constant 0 : index
    %c0_10 = arith.constant 0 : index
    %6 = vector.load %arg5[%c0_8, %c0_9, %c0_10] : memref<1x8x8xf32, #tpu.memory_space<vmem>>, vector<1x8x8xf32>
    %7 = vector.shape_cast %6 : vector<1x8x8xf32> to vector<8x8xf32>
    %8 = arith.negf %1 : vector<8x128xf32>
    %9 = math.exp %8 : vector<8x128xf32>
    %cst = arith.constant 1.000000e+00 : f32
    %10 = vector.broadcast %cst : f32 to vector<8x128xf32>
    %11 = arith.addf %10, %9 : vector<8x128xf32>
    %12 = arith.divf %10, %11 : vector<8x128xf32>
    %cst_11 = arith.constant 1.000000e+00 : f32
    %13 = vector.broadcast %cst_11 : f32 to vector<8x128xf32>
    %14 = arith.subf %13, %12 : vector<8x128xf32>
    %15 = arith.mulf %12, %12 : vector<8x128xf32>
    %cst_12 = arith.constant 7.500000e-01 : f32
    %16 = vector.broadcast %cst_12 : f32 to vector<8x128xf32>
    %17 = arith.mulf %16, %15 : vector<8x128xf32>
    %cst_13 = arith.constant 9.99999993E-9 : f32
    %18 = vector.broadcast %cst_13 : f32 to vector<8x128xf32>
    %19 = arith.addf %14, %18 : vector<8x128xf32>
    %20 = math.log %19 : vector<8x128xf32>
    %cst_14 = arith.constant 0.000000e+00 : f32
    %21 = vector.broadcast %cst_14 : f32 to vector<8x128xf32>
    %22 = arith.subf %21, %20 : vector<8x128xf32>
    %23 = arith.mulf %17, %22 : vector<8x128xf32>
    %24 = arith.mulf %14, %14 : vector<8x128xf32>
    %cst_15 = arith.constant 2.500000e-01 : f32
    %25 = vector.broadcast %cst_15 : f32 to vector<8x128xf32>
    %26 = arith.mulf %25, %24 : vector<8x128xf32>
    %cst_16 = arith.constant 9.99999993E-9 : f32
    %27 = vector.broadcast %cst_16 : f32 to vector<8x128xf32>
    %28 = arith.addf %12, %27 : vector<8x128xf32>
    %29 = math.log %28 : vector<8x128xf32>
    %cst_17 = arith.constant 0.000000e+00 : f32
    %30 = vector.broadcast %cst_17 : f32 to vector<8x128xf32>
    %31 = arith.subf %30, %29 : vector<8x128xf32>
    %32 = arith.mulf %26, %31 : vector<8x128xf32>
    %33 = arith.subf %32, %23 : vector<8x128xf32>
    %cst_18 = arith.constant dense<0.000000e+00> : vector<8x128xf32>
    %34 = tpu.matmul %7, %33, %cst_18 {dimension_numbers = #tpu.dot_dimension_numbers<[1], [0], [0], [1], [0, 0, 1, 1], [], []>} : vector<8x8xf32>, vector<8x128xf32>, vector<8x128xf32> -> vector<8x128xf32>
    %cst_19 = arith.constant 2.000000e+00 : f32
    %35 = vector.broadcast %cst_19 : f32 to vector<8x128xf32>
    %36 = arith.mulf %35, %34 : vector<8x128xf32>
    %37 = vector.extract_strided_slice %5 {offsets = [0, 0], sizes = [8, 1], strides = [1, 1]} : vector<8x7xf32> to vector<8x1xf32>
    %38 = vector.extract_strided_slice %3 {offsets = [0, 0], sizes = [1, 128], strides = [1, 1]} : vector<7x128xf32> to vector<1x128xf32>
    %39 = vector.broadcast %37 : vector<8x1xf32> to vector<8x128xf32>
    %40 = vector.broadcast %38 : vector<1x128xf32> to vector<8x128xf32>
    %41 = arith.subf %39, %40 : vector<8x128xf32>
    %42 = math.absf %41 : vector<8x128xf32>
    %cst_20 = arith.constant 5.000000e+00 : f32
    %43 = vector.broadcast %cst_20 : f32 to vector<8x128xf32>
    %44 = arith.mulf %43, %42 : vector<8x128xf32>
    %45 = arith.addf %36, %44 : vector<8x128xf32>
    %46 = vector.extract_strided_slice %5 {offsets = [0, 1], sizes = [8, 1], strides = [1, 1]} : vector<8x7xf32> to vector<8x1xf32>
    %47 = vector.extract_strided_slice %3 {offsets = [1, 0], sizes = [1, 128], strides = [1, 1]} : vector<7x128xf32> to vector<1x128xf32>
    %48 = vector.broadcast %46 : vector<8x1xf32> to vector<8x128xf32>
    %49 = vector.broadcast %47 : vector<1x128xf32> to vector<8x128xf32>
    %50 = arith.subf %48, %49 : vector<8x128xf32>
    %51 = math.absf %50 : vector<8x128xf32>
    %cst_21 = arith.constant 5.000000e+00 : f32
    %52 = vector.broadcast %cst_21 : f32 to vector<8x128xf32>
    %53 = arith.mulf %52, %51 : vector<8x128xf32>
    %54 = arith.addf %45, %53 : vector<8x128xf32>
    %55 = vector.extract_strided_slice %5 {offsets = [0, 2], sizes = [8, 1], strides = [1, 1]} : vector<8x7xf32> to vector<8x1xf32>
    %56 = vector.extract_strided_slice %3 {offsets = [2, 0], sizes = [1, 128], strides = [1, 1]} : vector<7x128xf32> to vector<1x128xf32>
    %57 = vector.broadcast %55 : vector<8x1xf32> to vector<8x128xf32>
    %58 = vector.broadcast %56 : vector<1x128xf32> to vector<8x128xf32>
    %59 = arith.subf %57, %58 : vector<8x128xf32>
    %60 = math.absf %59 : vector<8x128xf32>
    %cst_22 = arith.constant 5.000000e+00 : f32
    %61 = vector.broadcast %cst_22 : f32 to vector<8x128xf32>
    %62 = arith.mulf %61, %60 : vector<8x128xf32>
    %63 = arith.addf %54, %62 : vector<8x128xf32>
    %64 = vector.extract_strided_slice %5 {offsets = [0, 3], sizes = [8, 1], strides = [1, 1]} : vector<8x7xf32> to vector<8x1xf32>
    %65 = vector.extract_strided_slice %3 {offsets = [3, 0], sizes = [1, 128], strides = [1, 1]} : vector<7x128xf32> to vector<1x128xf32>
    %66 = vector.broadcast %64 : vector<8x1xf32> to vector<8x128xf32>
    %67 = vector.broadcast %65 : vector<1x128xf32> to vector<8x128xf32>
    %68 = arith.subf %66, %67 : vector<8x128xf32>
    %69 = math.absf %68 : vector<8x128xf32>
    %cst_23 = arith.constant 5.000000e+00 : f32
    %70 = vector.broadcast %cst_23 : f32 to vector<8x128xf32>
    %71 = arith.mulf %70, %69 : vector<8x128xf32>
    %72 = arith.addf %63, %71 : vector<8x128xf32>
    %73 = vector.extract_strided_slice %5 {offsets = [0, 4], sizes = [8, 1], strides = [1, 1]} : vector<8x7xf32> to vector<8x1xf32>
    %74 = vector.extract_strided_slice %3 {offsets = [4, 0], sizes = [1, 128], strides = [1, 1]} : vector<7x128xf32> to vector<1x128xf32>
    %75 = vector.broadcast %73 : vector<8x1xf32> to vector<8x128xf32>
    %76 = vector.broadcast %74 : vector<1x128xf32> to vector<8x128xf32>
    %77 = arith.subf %75, %76 : vector<8x128xf32>
    %78 = math.absf %77 : vector<8x128xf32>
    %cst_24 = arith.constant 5.000000e+00 : f32
    %79 = vector.broadcast %cst_24 : f32 to vector<8x128xf32>
    %80 = arith.mulf %79, %78 : vector<8x128xf32>
    %81 = arith.addf %72, %80 : vector<8x128xf32>
    %82 = vector.extract_strided_slice %5 {offsets = [0, 5], sizes = [8, 1], strides = [1, 1]} : vector<8x7xf32> to vector<8x1xf32>
    %83 = vector.extract_strided_slice %3 {offsets = [5, 0], sizes = [1, 128], strides = [1, 1]} : vector<7x128xf32> to vector<1x128xf32>
    %84 = vector.broadcast %82 : vector<8x1xf32> to vector<8x128xf32>
    %85 = vector.broadcast %83 : vector<1x128xf32> to vector<8x128xf32>
    %86 = arith.subf %84, %85 : vector<8x128xf32>
    %87 = math.absf %86 : vector<8x128xf32>
    %cst_25 = arith.constant 5.000000e+00 : f32
    %88 = vector.broadcast %cst_25 : f32 to vector<8x128xf32>
    %89 = arith.mulf %88, %87 : vector<8x128xf32>
    %90 = arith.addf %81, %89 : vector<8x128xf32>
    %91 = vector.extract_strided_slice %5 {offsets = [0, 6], sizes = [8, 1], strides = [1, 1]} : vector<8x7xf32> to vector<8x1xf32>
    %92 = vector.extract_strided_slice %3 {offsets = [6, 0], sizes = [1, 128], strides = [1, 1]} : vector<7x128xf32> to vector<1x128xf32>
    %93 = vector.broadcast %91 : vector<8x1xf32> to vector<8x128xf32>
    %94 = vector.broadcast %92 : vector<1x128xf32> to vector<8x128xf32>
    %95 = arith.subf %93, %94 : vector<8x128xf32>
    %96 = math.absf %95 : vector<8x128xf32>
    %cst_26 = arith.constant 4.000000e+00 : f32
    %97 = vector.broadcast %cst_26 : f32 to vector<8x128xf32>
    %98 = arith.mulf %97, %96 : vector<8x128xf32>
    %99 = arith.addf %90, %98 : vector<8x128xf32>
    %100 = vector.extract_strided_slice %3 {offsets = [0, 0], sizes = [1, 128], strides = [1, 1]} : vector<7x128xf32> to vector<1x128xf32>
    %101 = vector.extract_strided_slice %3 {offsets = [3, 0], sizes = [1, 128], strides = [1, 1]} : vector<7x128xf32> to vector<1x128xf32>
    %102 = vector.extract_strided_slice %5 {offsets = [0, 0], sizes = [8, 1], strides = [1, 1]} : vector<8x7xf32> to vector<8x1xf32>
    %103 = vector.extract_strided_slice %5 {offsets = [0, 3], sizes = [8, 1], strides = [1, 1]} : vector<8x7xf32> to vector<8x1xf32>
    %cst_27 = arith.constant 5.000000e-01 : f32
    %104 = vector.broadcast %cst_27 : f32 to vector<1x128xf32>
    %105 = arith.mulf %104, %101 : vector<1x128xf32>
    %106 = arith.subf %100, %105 : vector<1x128xf32>
    %cst_28 = arith.constant 5.000000e-01 : f32
    %107 = vector.broadcast %cst_28 : f32 to vector<1x128xf32>
    %108 = arith.mulf %107, %101 : vector<1x128xf32>
    %109 = arith.addf %100, %108 : vector<1x128xf32>
    %cst_29 = arith.constant 5.000000e-01 : f32
    %110 = vector.broadcast %cst_29 : f32 to vector<8x1xf32>
    %111 = arith.mulf %110, %103 : vector<8x1xf32>
    %112 = arith.subf %102, %111 : vector<8x1xf32>
    %cst_30 = arith.constant 5.000000e-01 : f32
    %113 = vector.broadcast %cst_30 : f32 to vector<8x1xf32>
    %114 = arith.mulf %113, %103 : vector<8x1xf32>
    %115 = arith.addf %102, %114 : vector<8x1xf32>
    %116 = vector.broadcast %109 : vector<1x128xf32> to vector<8x128xf32>
    %117 = vector.broadcast %115 : vector<8x1xf32> to vector<8x128xf32>
    %118 = arith.minimumf %116, %117 : vector<8x128xf32>
    %119 = vector.broadcast %106 : vector<1x128xf32> to vector<8x128xf32>
    %120 = vector.broadcast %112 : vector<8x1xf32> to vector<8x128xf32>
    %121 = arith.maximumf %119, %120 : vector<8x128xf32>
    %122 = arith.subf %118, %121 : vector<8x128xf32>
    %cst_31 = arith.constant 0.000000e+00 : f32
    %123 = vector.broadcast %cst_31 : f32 to vector<8x128xf32>
    %124 = arith.maximumf %122, %123 : vector<8x128xf32>
    %125 = vector.broadcast %109 : vector<1x128xf32> to vector<8x128xf32>
    %126 = vector.broadcast %115 : vector<8x1xf32> to vector<8x128xf32>
    %127 = arith.maximumf %125, %126 : vector<8x128xf32>
    %128 = vector.broadcast %106 : vector<1x128xf32> to vector<8x128xf32>
    %129 = vector.broadcast %112 : vector<8x1xf32> to vector<8x128xf32>
    %130 = arith.minimumf %128, %129 : vector<8x128xf32>
    %131 = arith.subf %127, %130 : vector<8x128xf32>
    %132 = vector.extract_strided_slice %3 {offsets = [1, 0], sizes = [1, 128], strides = [1, 1]} : vector<7x128xf32> to vector<1x128xf32>
    %133 = vector.extract_strided_slice %3 {offsets = [4, 0], sizes = [1, 128], strides = [1, 1]} : vector<7x128xf32> to vector<1x128xf32>
    %134 = vector.extract_strided_slice %5 {offsets = [0, 1], sizes = [8, 1], strides = [1, 1]} : vector<8x7xf32> to vector<8x1xf32>
    %135 = vector.extract_strided_slice %5 {offsets = [0, 4], sizes = [8, 1], strides = [1, 1]} : vector<8x7xf32> to vector<8x1xf32>
    %cst_32 = arith.constant 5.000000e-01 : f32
    %136 = vector.broadcast %cst_32 : f32 to vector<1x128xf32>
    %137 = arith.mulf %136, %133 : vector<1x128xf32>
    %138 = arith.subf %132, %137 : vector<1x128xf32>
    %cst_33 = arith.constant 5.000000e-01 : f32
    %139 = vector.broadcast %cst_33 : f32 to vector<1x128xf32>
    %140 = arith.mulf %139, %133 : vector<1x128xf32>
    %141 = arith.addf %132, %140 : vector<1x128xf32>
    %cst_34 = arith.constant 5.000000e-01 : f32
    %142 = vector.broadcast %cst_34 : f32 to vector<8x1xf32>
    %143 = arith.mulf %142, %135 : vector<8x1xf32>
    %144 = arith.subf %134, %143 : vector<8x1xf32>
    %cst_35 = arith.constant 5.000000e-01 : f32
    %145 = vector.broadcast %cst_35 : f32 to vector<8x1xf32>
    %146 = arith.mulf %145, %135 : vector<8x1xf32>
    %147 = arith.addf %134, %146 : vector<8x1xf32>
    %148 = vector.broadcast %141 : vector<1x128xf32> to vector<8x128xf32>
    %149 = vector.broadcast %147 : vector<8x1xf32> to vector<8x128xf32>
    %150 = arith.minimumf %148, %149 : vector<8x128xf32>
    %151 = vector.broadcast %138 : vector<1x128xf32> to vector<8x128xf32>
    %152 = vector.broadcast %144 : vector<8x1xf32> to vector<8x128xf32>
    %153 = arith.maximumf %151, %152 : vector<8x128xf32>
    %154 = arith.subf %150, %153 : vector<8x128xf32>
    %cst_36 = arith.constant 0.000000e+00 : f32
    %155 = vector.broadcast %cst_36 : f32 to vector<8x128xf32>
    %156 = arith.maximumf %154, %155 : vector<8x128xf32>
    %157 = vector.broadcast %141 : vector<1x128xf32> to vector<8x128xf32>
    %158 = vector.broadcast %147 : vector<8x1xf32> to vector<8x128xf32>
    %159 = arith.maximumf %157, %158 : vector<8x128xf32>
    %160 = vector.broadcast %138 : vector<1x128xf32> to vector<8x128xf32>
    %161 = vector.broadcast %144 : vector<8x1xf32> to vector<8x128xf32>
    %162 = arith.minimumf %160, %161 : vector<8x128xf32>
    %163 = arith.subf %159, %162 : vector<8x128xf32>
    %164 = arith.mulf %124, %156 : vector<8x128xf32>
    %165 = arith.mulf %131, %163 : vector<8x128xf32>
    %166 = vector.extract_strided_slice %3 {offsets = [2, 0], sizes = [1, 128], strides = [1, 1]} : vector<7x128xf32> to vector<1x128xf32>
    %167 = vector.extract_strided_slice %3 {offsets = [5, 0], sizes = [1, 128], strides = [1, 1]} : vector<7x128xf32> to vector<1x128xf32>
    %168 = vector.extract_strided_slice %5 {offsets = [0, 2], sizes = [8, 1], strides = [1, 1]} : vector<8x7xf32> to vector<8x1xf32>
    %169 = vector.extract_strided_slice %5 {offsets = [0, 5], sizes = [8, 1], strides = [1, 1]} : vector<8x7xf32> to vector<8x1xf32>
    %cst_37 = arith.constant 5.000000e-01 : f32
    %170 = vector.broadcast %cst_37 : f32 to vector<1x128xf32>
    %171 = arith.mulf %170, %167 : vector<1x128xf32>
    %172 = arith.subf %166, %171 : vector<1x128xf32>
    %cst_38 = arith.constant 5.000000e-01 : f32
    %173 = vector.broadcast %cst_38 : f32 to vector<1x128xf32>
    %174 = arith.mulf %173, %167 : vector<1x128xf32>
    %175 = arith.addf %166, %174 : vector<1x128xf32>
    %cst_39 = arith.constant 5.000000e-01 : f32
    %176 = vector.broadcast %cst_39 : f32 to vector<8x1xf32>
    %177 = arith.mulf %176, %169 : vector<8x1xf32>
    %178 = arith.subf %168, %177 : vector<8x1xf32>
    %cst_40 = arith.constant 5.000000e-01 : f32
    %179 = vector.broadcast %cst_40 : f32 to vector<8x1xf32>
    %180 = arith.mulf %179, %169 : vector<8x1xf32>
    %181 = arith.addf %168, %180 : vector<8x1xf32>
    %182 = vector.broadcast %175 : vector<1x128xf32> to vector<8x128xf32>
    %183 = vector.broadcast %181 : vector<8x1xf32> to vector<8x128xf32>
    %184 = arith.minimumf %182, %183 : vector<8x128xf32>
    %185 = vector.broadcast %172 : vector<1x128xf32> to vector<8x128xf32>
    %186 = vector.broadcast %178 : vector<8x1xf32> to vector<8x128xf32>
    %187 = arith.maximumf %185, %186 : vector<8x128xf32>
    %188 = arith.subf %184, %187 : vector<8x128xf32>
    %cst_41 = arith.constant 0.000000e+00 : f32
    %189 = vector.broadcast %cst_41 : f32 to vector<8x128xf32>
    %190 = arith.maximumf %188, %189 : vector<8x128xf32>
    %191 = vector.broadcast %175 : vector<1x128xf32> to vector<8x128xf32>
    %192 = vector.broadcast %181 : vector<8x1xf32> to vector<8x128xf32>
    %193 = arith.maximumf %191, %192 : vector<8x128xf32>
    %194 = vector.broadcast %172 : vector<1x128xf32> to vector<8x128xf32>
    %195 = vector.broadcast %178 : vector<8x1xf32> to vector<8x128xf32>
    %196 = arith.minimumf %194, %195 : vector<8x128xf32>
    %197 = arith.subf %193, %196 : vector<8x128xf32>
    %198 = arith.mulf %164, %190 : vector<8x128xf32>
    %199 = arith.mulf %165, %197 : vector<8x128xf32>
    %200 = vector.extract_strided_slice %3 {offsets = [3, 0], sizes = [1, 128], strides = [1, 1]} : vector<7x128xf32> to vector<1x128xf32>
    %201 = vector.extract_strided_slice %3 {offsets = [4, 0], sizes = [1, 128], strides = [1, 1]} : vector<7x128xf32> to vector<1x128xf32>
    %202 = arith.mulf %200, %201 : vector<1x128xf32>
    %203 = vector.extract_strided_slice %3 {offsets = [5, 0], sizes = [1, 128], strides = [1, 1]} : vector<7x128xf32> to vector<1x128xf32>
    %204 = arith.mulf %202, %203 : vector<1x128xf32>
    %205 = vector.extract_strided_slice %5 {offsets = [0, 3], sizes = [8, 1], strides = [1, 1]} : vector<8x7xf32> to vector<8x1xf32>
    %206 = vector.extract_strided_slice %5 {offsets = [0, 4], sizes = [8, 1], strides = [1, 1]} : vector<8x7xf32> to vector<8x1xf32>
    %207 = arith.mulf %205, %206 : vector<8x1xf32>
    %208 = vector.extract_strided_slice %5 {offsets = [0, 5], sizes = [8, 1], strides = [1, 1]} : vector<8x7xf32> to vector<8x1xf32>
    %209 = arith.mulf %207, %208 : vector<8x1xf32>
    %210 = vector.broadcast %204 : vector<1x128xf32> to vector<8x128xf32>
    %211 = vector.broadcast %209 : vector<8x1xf32> to vector<8x128xf32>
    %212 = arith.addf %210, %211 : vector<8x128xf32>
    %213 = arith.subf %212, %198 : vector<8x128xf32>
    %214 = tpu.reciprocal %213 {approx = true} : vector<8x128xf32> -> vector<8x128xf32>
    %215 = tpu.reciprocal %199 {approx = true} : vector<8x128xf32> -> vector<8x128xf32>
    %216 = arith.mulf %198, %214 : vector<8x128xf32>
    %217 = arith.subf %199, %213 : vector<8x128xf32>
    %218 = arith.mulf %217, %215 : vector<8x128xf32>
    %219 = arith.subf %216, %218 : vector<8x128xf32>
    %cst_42 = arith.constant 0.000000e+00 : f32
    %220 = vector.broadcast %cst_42 : f32 to vector<8x128xf32>
    %221 = arith.subf %220, %219 : vector<8x128xf32>
    %cst_43 = arith.constant 2.000000e+00 : f32
    %222 = vector.broadcast %cst_43 : f32 to vector<8x128xf32>
    %223 = arith.mulf %222, %221 : vector<8x128xf32>
    %224 = arith.addf %99, %223 : vector<8x128xf32>
    %c0_44 = arith.constant 0 : index
    %c0_45 = arith.constant 0 : index
    %c0_46 = arith.constant 0 : index
    %225 = vector.load %arg6[%c0_44, %c0_45, %c0_46] : memref<1x8x128xf32, #tpu.memory_space<vmem>>, vector<1x8x128xf32>
    %226 = vector.shape_cast %225 : vector<1x8x128xf32> to vector<8x128xf32>
    %227 = vector.shape_cast %224 : vector<8x128xf32> to vector<1x8x128xf32>
    tpu.vector_store %arg6[%c0_44, %c0_45, %c0_46], %227 {strides = array<i32>} : memref<1x8x128xf32, #tpu.memory_space<vmem>>, vector<1x8x128xf32>,
    return
  }
  func.func @transform_0(%arg0: i32, %arg1: i32) -> (i32, i32, i32) {
    %c0_i32 = arith.constant 0 : i32
    %c0_i32_0 = arith.constant 0 : i32
    return %arg0, %c0_i32, %arg1 : i32, i32, i32
  }
  func.func @transform_1(%arg0: i32, %arg1: i32) -> (i32, i32, i32) {
    %c0_i32 = arith.constant 0 : i32
    %c0_i32_0 = arith.constant 0 : i32
    return %arg0, %c0_i32, %arg1 : i32, i32, i32
  }
  func.func @transform_2(%arg0: i32, %arg1: i32) -> (i32, i32, i32) {
    %c0_i32 = arith.constant 0 : i32
    %c0_i32_0 = arith.constant 0 : i32
    %c0_i32_1 = arith.constant 0 : i32
    return %arg0, %c0_i32, %c0_i32_0 : i32, i32, i32
  }
  func.func @transform_3(%arg0: i32, %arg1: i32) -> (i32, i32, i32) {
    %c0_i32 = arith.constant 0 : i32
    %c0_i32_0 = arith.constant 0 : i32
    %c0_i32_1 = arith.constant 0 : i32
    return %arg0, %c0_i32, %c0_i32_0 : i32, i32, i32
  }
  func.func @transform_4(%arg0: i32, %arg1: i32) -> (i32, i32, i32) {
    %c0_i32 = arith.constant 0 : i32
    %c0_i32_0 = arith.constant 0 : i32
    return %arg0, %c0_i32, %arg1 : i32, i32, i32
  }
}

</mosaic_0001>

<bundles_post_ra>
// kernel: tpu_custom_call.1
= control target key start
LH: loop header
LB: loop body
LE: loop exit
PB: predicated region body
PF: predicated region fallthrough
CT: control target
= control target key end

     0   :  { %9 = vsyncpa [#allocation3], 0  ;;  %s1120_s0 = inlined_call_operand.vmem [shape: f32[2,8,128], index: 0, kind: input, shape index: {}]   ;;  %s1121_s1 = inlined_call_operand.vmem [shape: f32[2,7,128], index: 1, kind: input, shape index: {}]   ;;  %s1122_s2 = inlined_call_operand.vmem [shape: f32[2,8,7], index: 2, kind: input, shape index: {}]   ;;  %s1123_s3 = inlined_call_operand.vmem [shape: f32[2,8,8], index: 3, kind: input, shape index: {}]   ;;  %s1124_s4 = inlined_call_operand.hbm [shape: f32[2,8,128], index: 4, kind: output, shape index: {}]  }
   0x1   :  { %11 = vsyncpa [#allocation3 + $0x1], 0  ;;  %s949_s15 = smov 0   ;;  %s951_s16 = smov 0  }
   0x2   :  { %s953_s17 = smov 0   ;;  %s955_s18 = smov 0  }
   0x3   :  { %s957_s19 = smov 0   ;;  %s959_s20 = smov 0  }
   0x4 LB: > { %s715_s21 = sadd.s32 4294967295, %s909_s20   ;;  %s716_s22 = sadd.s32 4294967294, %s909_s20   ;;  %s909_s20 = sphi %s959_s20, %s17_s20   ;;  %s905_s19 = sphi %s957_s19, %s1131_s19   ;;  %s901_s18 = sphi %s955_s18, %s1130_s18   ;;  %s897_s17 = sphi %s953_s17, %s1129_s17   ;;  %s893_s16 = sphi %s951_s16, %s1128_s16   ;;  %s889_s15 = sphi %s949_s15, %s1127_s15  }
   0x5   : > { %s29_s23 = sadd.s32 1, %s905_s19  ;;  %s146_s24 = sadd.s32 1, %s897_s17 }
   0x6   : > { %p31_p0 = scmp.ge.s32.totalorder %s29_s23, 2  ;;  %p156_p1 = scmp.ne.s32.totalorder %s897_s17, %s893_s16 }
   0x7   : > { %p157_p2 = scmp.eq.s32.totalorder %s715_s21, 1  ;;  %p162_p3 = scmp.ne.s32.totalorder %s893_s16, %s889_s15 }
   0x8   : > { %s1133_s23 = smov (%p31_p0, %s29_s23), 0  ;;  %p163_p5 = scmp.eq.s32.totalorder %s716_s22, 1 }
   0x9   : > { %p989_p4 = por %p157_p2, %p156_p1  ;;  %s141_s26 = ssub.s32 %s905_s19, %s1133_s23 }
   0xa   : > { %p719_p6 = scmp.ge.s32.totalorder %s909_s20, 1  ;;  %p144_p7 = scmp.eq.s32.totalorder %s141_s26, 0 }
   0xb   : > { %p996_p8 = por %p163_p5, %p162_p3  ;;  %p215_p9 = scmp.lt.s32.totalorder %s909_s20, 3 }
   0xc   : > { %s1002_s28 = scalar_select %p144_p7, %s897_s17, %s146_s24  }
   0xd   : > { %p216_p10 = pnand %p719_p6, %p215_p9 }
   0xe   : > { %p258_p11 = scmp.lt.s32.totalorder (!%p216_p10), %s901_s18, 1  ;;  %v911_v0 = vmov (!%p216_p10), 0.0   ;;  %vm912_vm0 = vmmov (!%p216_p10), 0   ;;  %v913_v1 = vmov (!%p216_p10), 0   ;;  %s914_s11 = smov (!%p216_p10), 126   ;;  %vm306_vm1 = vcmask (!%p216_p10), 64512  }
   0xf   : > { %219 = sbr.rel (%p216_p10) target bundleno = 339 (0x153), region = 36  ;;  %733 = vmatprep.subr.mxu0 (!%p216_p10), %v911_v0  ;;  %735 = vmatprep.mubr.msk.f32.mxu0 (!%p216_p10), %vm912_vm0, %v911_v0  ;;  %s915_s12 = smov (!%p216_p10), 125   ;;  %v917_v29 = vmov (!%p216_p10), 1   ;;  %v918_v30 = vmov (!%p216_p10), 2   ;;  %v919_v34 = vmov (!%p216_p10), 3   ;;  %v920_v36 = vmov (!%p216_p10), 6  }
  0x10   : > { %806 = vset.pattern.permute.xlu0 (!%p216_p10), %v913_v1  ;;  %805 = vset.pattern.permute.xlu1 (!%p216_p10), %v913_v1  ;;  %s916_s13 = smov (!%p216_p10), 127   ;;  %v921_v37 = vmov (!%p216_p10), 4   ;;  %v922_v38 = vmov (!%p216_p10), 5   ;;  %v386_v40 = vlaneseq (!%p216_p10)  ;;  %s728_s6 = sshll.u32 (!%p216_p10), %s901_s18, 7 }
  0x12   : > { %v1042_v42 = vshrl.u32 (!%p216_p10), %v386_v40, 7 }
  0x14   : > { %v388_v45 = vsub.s32 (!%p216_p10), 0, %v1042_v42  ;;  %v400_v48 = vsub.s32 (!%p216_p10), 1, %v1042_v42  ;;  %v1050_v55 = vsub.s32 (!%p216_p10), 2, %v1042_v42 }
  0x16   : > { %s259_s29 = scalar_select %p258_p11, %s901_s18, 1 }
  0x17   : > { %s923_s18 = smov [#allocation2]  }
  0x18   : > { %s1006_s30 = sshll.u32 %s259_s29, 3  ;;  %s835_s14 = sshll.u32 %s923_s18, 4  ;;  %s836_s14 = int_to_ptr.vmem [resolvable:$false] %s835_s14 }
  0x19   : > { %s275_s7 = scalar_lea.vmem %s1122_s2, %s1006_s30  ;;  %s264_s10 = scalar_lea.vmem %s1120_s0, %s1006_s30 }
  0x1a   : > { %v1016_v2 = vld [vmem:[%s275_s7] sm:$0xff]  ;;  %s279_s22 = scalar_lea.vmem %s1123_s3, %s1006_s30  ;;  %s271_s29 = scalar_lea.vmem %s1121_s1, %s1006_s30 }
  0x1b   : > { %v280_v3 = vld [vmem:[%s264_s10] sm:$0xff]  ;;  %v472_v4 = vmul.f32 0.5, %v1016_v2  ;;  %565 = vrot.lane.b32.xlu1 %v1016_v2, %s914_s11  ;;  %s255_s30 = sand.u32 1, %s893_s16   ;;  %s1073_s11 = scalar_lea.hbm %s1124_s4, %s728_s6 }
  0x1c   : > { %v725_v5 = vmul.f32 -1.442695, %v280_v3  ;;  %v283_v25 = vld [vmem:[%s279_s22] sm:$0xff]  ;;  %s720_s5 = sshll.u32 %s255_s30, 3  ;;  %s837_s21 = scalar_lea.vmem %s836_s14, 256 }
  0x1d   : > { %474 = vrot.lane.b32.xlu0 %v472_v4, %s915_s12  ;;  %v1039_v39 = vld [vmem:[%s271_s29] sm:$0x7f]  ;;  %v424_v4 = vsub.s32 3, %v1042_v42  ;;  %s257_s7 = scalar_lea.vmem [#allocation2], %s720_s5  ;;  %s591_s12 = scalar_lea.sflag [#allocation3], %s255_s30 }
  0x1e   : > { %819 = vpow2.f32 %v725_v5  ;;  %v466_v41 = vmul.f32 0.5, %v1039_v39  ;;  %v555_v49 = vrot.slane %v1039_v39, 1  ;;  %v558_v58 = vrot.slane %v1039_v39, 2  ;;  %s605_s8 = sshll.u32 %s257_s7, 4  ;;  %s1075_s8 = int_to_ptr.vmem [resolvable:$true] %s605_s8 }
  0x1f   : > { %v425_v40 = vrot.slane %v1039_v39, %v424_v4  ;;  %p838_p1 = scmp.lt.s32.totalorder %s1075_s8, %s836_s14 }
  0x20   : > { %v468_v43 = vrot.slane %v466_v41, 3  ;;  %v557_v57 = vmul.f32 %v555_v49, %v1039_v39  ;;  %v436_v49 = vsub.s32 4, %v1042_v42 }
  0x21   : > { %561 = vrot.lane.b32.xlu0 %v1016_v2, %s916_s13  ;;  %s831_s13 = scalar_lea.vmem %s1075_s8, 128 }
  0x22   : > { %v471_v46 = vadd.f32 %v468_v43, %v1039_v39  ;;  %v470_v47 = vsub.f32 %v1039_v39, %v468_v43  ;;  %v560_v5 = vmul.f32 %v558_v58, %v557_v57  ;;  %v448_v57 = vsub.s32 5, %v1042_v42  ;;  %p832_p12 = scmp.ne.s32.totalorder %s1075_s8, %s831_s13  ;;  %p839_p2 = scmp.lt.s32.totalorder %s837_s21, %s831_s13 }
  0x24   : > { %v482_v50 = vrot.slane %v471_v46, %v388_v45  ;;  %v492_v52 = vrot.slane %v470_v47, %v388_v45  ;;  %v507_v54 = vrot.slane %v471_v46, %v400_v48  ;;  %v516_v56 = vrot.slane %v470_v47, %v400_v48  ;;  %p833_p13 = pnand %p832_p12, %p989_p4  ;;  %p840_p3 = por %p839_p2, %p838_p1 }
  0x25   : > { %v532_v63 = vrot.slane %v471_v46, %v1050_v55  ;;  %v541_v3 = vrot.slane %v470_v47, %v1050_v55  ;;  %v413_v46 = vrot.slane %v1039_v39, %v1050_v55 }
  0x26   : > { %p834_p0 = pneg %p833_p13 }
  0x28   : > { %v820_v6 = vpop.eup %819  ;;  %p841_p5 = pnand %p840_p3, %p834_p0 }
  0x29   : > { %v287_v7 = vadd.f32 1.0, %v820_v6 }
  0x2b   : > { %821 = vrcp.f32 %v287_v7 }
  0x35   : > { %v822_v8 = vpop.eup %821 }
  0x36   : > { %v290_v9 = vsub.f32 1.0, %v822_v8  ;;  %v300_v10 = vadd.f32 1e-08, %v822_v8  ;;  %v291_v13 = vmul.f32 %v822_v8, %v822_v8 }
  0x38   : > { %v293_v11 = vadd.f32 1e-08, %v290_v9  ;;  %823 = vlog2.f32 %v300_v10  ;;  %v298_v12 = vmul.f32 %v290_v9, %v290_v9  ;;  %v292_v18 = vmul.f32 0.75, %v291_v13 }
  0x3a   : > { %825 = vlog2.f32 %v293_v11  ;;  %v299_v15 = vmul.f32 0.25, %v298_v12 }
  0x42   : > { %v824_v14 = vpop.eup %823 }
  0x43   : > { %v302_v16 = vmul.f32 0.6931472, %v824_v14  ;;  %v389_v14 = vrot.slane %v1039_v39, %v388_v45 }
  0x44   : > { %v826_v17 = vpop.eup %825 }
  0x45   : > { %v295_v19 = vmul.f32 0.6931472, %v826_v17  ;;  %v303_v20 = vsub.f32 0.0, %v302_v16 }
  0x47   : > { %v296_v21 = vsub.f32 0.0, %v295_v19  ;;  %v304_v22 = vmul.f32 %v303_v20, %v299_v15 }
  0x49   : > { %v297_v23 = vmul.f32 %v296_v21, %v292_v18 }
  0x4b   : > { %v305_v24 = vsub.f32 %v304_v22, %v297_v23  ;;  %v572_v22 = vrot.slane %v560_v5, %v424_v4 }
  0x4d   : > { %734 = vmatpush3.msra.mxu0 %v305_v24 }
  0x4e   : > { %736 = vmatmul.mubr.msk.f32.vlgmr.msra.gmra.mrb[0].mxu0 %vm306_vm1, %v283_v25 }
  0x8d   : > { %v566_v33 = vpop.permute.xlu1 %565 }
  0x8f   : > { %v475_v26 = vpop.permute.xlu0 %474 }
  0x90   : > { %v477_v27 = vsub.f32 %v1016_v2, %v475_v26  ;;  %v478_v28 = vadd.f32 %v475_v26, %v1016_v2 }
  0x92   : > { %485 = vperm.xlu1 %805, %v478_v28   ;;  %495 = vperm.xlu0 %806, %v477_v27  }
  0x93   : > { %v562_v31 = vpop.permute.xlu0 %561 }
  0x94   : > { %v564_v32 = vmul.f32 %v562_v31, %v1016_v2 }
  0x96   : > { %807 = vset.pattern.permute.xlu1 %v917_v29  ;;  %808 = vset.pattern.permute.xlu0 %v918_v30  ;;  %v568_v35 = vmul.f32 %v566_v33, %v564_v32 }
  0x97   : > { %509 = vperm.xlu1 %807, %v478_v28   ;;  %534 = vperm.xlu0 %808, %v478_v28  }
  0x9b   : > { %518 = vperm.xlu1 %807, %v477_v27   ;;  %809 = vset.pattern.permute.xlu0 %v913_v1 }
  0x9c   : > { %383 = vperm.xlu0 %809, %v1016_v2  }
  0x9f   : > { %810 = vset.pattern.permute.xlu1 %v918_v30 }
  0xa0   : > { %543 = vperm.xlu1 %810, %v477_v27   ;;  %814 = vset.pattern.permute.xlu0 %v919_v34 }
  0xa1   : > { %419 = vperm.xlu0 %814, %v1016_v2  }
  0xa4   : > { %811 = vset.pattern.permute.xlu1 %v919_v34 }
  0xa5   : > { %575 = vperm.xlu1 %811, %v568_v35   ;;  %817 = vset.pattern.permute.xlu0 %v920_v36  ;;  %v401_v35 = vrot.slane %v1039_v39, %v400_v48 }
  0xa6   : > { %455 = vperm.xlu0 %817, %v1016_v2  }
  0xa9   : > { %812 = vset.pattern.permute.xlu1 %v917_v29 }
  0xaa   : > { %395 = vperm.xlu1 %812, %v1016_v2   ;;  %818 = vset.pattern.permute.xlu0 %v919_v34 }
  0xae   : > { %813 = vset.pattern.permute.xlu1 %v918_v30 }
  0xaf   : > { %407 = vperm.xlu1 %813, %v1016_v2  }
  0xb3   : > { %815 = vset.pattern.permute.xlu1 %v921_v37 }
  0xb4   : > { %431 = vperm.xlu1 %815, %v1016_v2  }
  0xb8   : > { %816 = vset.pattern.permute.xlu1 %v922_v38 }
  0xb9   : > { %443 = vperm.xlu1 %816, %v1016_v2  }
 0x111   : > { %v486_v44 = vpop.permute.xlu1 %485  ;;  %v496_v51 = vpop.permute.xlu0 %495 }
 0x112   : > { %v488_v59 = vmin.f32 %v482_v50, %v486_v44  ;;  %v498_v60 = vmax.f32 %v492_v52, %v496_v51  ;;  %v501_v6 = vmax.f32 %v482_v50, %v486_v44  ;;  %v502_v7 = vmin.f32 %v492_v52, %v496_v51 }
 0x113   : > { %v460_v50 = vsub.s32 6, %v1042_v42 }
 0x114   : > { %v499_v10 = vsub.f32 %v488_v59, %v498_v60  ;;  %v503_v21 = vsub.f32 %v501_v6, %v502_v7 }
 0x115   : > { %v461_v58 = vrot.slane %v1039_v39, %v460_v50 }
 0x116   : > { %v510_v53 = vpop.permute.xlu1 %509  ;;  %v535_v2 = vpop.permute.xlu0 %534  ;;  %v500_v24 = vmax.f32 %v499_v10, 0.0 }
 0x117   : > { %v512_v62 = vmin.f32 %v507_v54, %v510_v53  ;;  %v524_v8 = vmax.f32 %v507_v54, %v510_v53  ;;  %v537_v11 = vmin.f32 %v532_v63, %v535_v2  ;;  %v549_v15 = vmax.f32 %v532_v63, %v535_v2 }
 0x11a   : > { %v519_v61 = vpop.permute.xlu1 %518 }
 0x11b   : > { %v521_v0 = vmax.f32 %v516_v56, %v519_v61  ;;  %v525_v1 = vmin.f32 %v516_v56, %v519_v61  ;;  %v384_v19 = vpop.permute.xlu0 %383  ;;  %v437_v56 = vrot.slane %v1039_v39, %v436_v49 }
 0x11c   : > { %v390_v28 = vsub.f32 %v384_v19, %v389_v14 }
 0x11d   : > { %v522_v9 = vsub.f32 %v512_v62, %v521_v0  ;;  %v526_v12 = vsub.f32 %v524_v8, %v525_v1 }
 0x11e   : > { %v391_v36 = vand.u32 2147483647, %v390_v28 }
 0x11f   : > { %v544_v13 = vpop.permute.xlu1 %543  ;;  %v523_v16 = vmax.f32 %v522_v9, 0.0  ;;  %v528_v27 = vmul.f32 %v526_v12, %v503_v21 }
 0x120   : > { %v546_v17 = vmax.f32 %v541_v3, %v544_v13  ;;  %v550_v18 = vmin.f32 %v541_v3, %v544_v13  ;;  %v420_v43 = vpop.permute.xlu0 %419  ;;  %v392_v44 = vmul.f32 5.0, %v391_v36  ;;  %v449_v3 = vrot.slane %v1039_v39, %v448_v57 }
 0x121   : > { %v376_v20 = vpop.f32.mrb[0].mxu0  ;;  %v527_v29 = vmul.f32 %v523_v16, %v500_v24  ;;  %v426_v48 = vsub.f32 %v420_v43, %v425_v40 }
 0x122   : > { %v737_v23 = vpop.f32.mrb[1].mxu0  ;;  %v547_v25 = vsub.f32 %v537_v11, %v546_v17  ;;  %v551_v26 = vsub.f32 %v549_v15, %v550_v18  ;;  %v380_v45 = vmul.f32 2.0, %v376_v20 }
 0x123   : > { %v427_v60 = vand.u32 2147483647, %v426_v48 }
 0x124   : > { %v548_v30 = vmax.f32 %v547_v25, 0.0  ;;  %v576_v31 = vpop.permute.xlu1 %575  ;;  %v553_v32 = vmul.f32 %v551_v26, %v528_v27  ;;  %v393_v53 = vadd.f32 %v392_v44, %v380_v45 }
 0x125   : > { %v578_v33 = vadd.f32 %v576_v31, %v572_v22  ;;  %v456_v55 = vpop.permute.xlu0 %455  ;;  %v428_v8 = vmul.f32 5.0, %v427_v60 }
 0x126   : > { %v552_v34 = vmul.f32 %v548_v30, %v527_v29  ;;  %827 = vrcp.f32 %v553_v32  ;;  %v462_v4 = vsub.f32 %v456_v55, %v461_v58 }
 0x128   : > { %v579_v37 = vsub.f32 %v578_v33, %v552_v34  ;;  %v463_v11 = vand.u32 2147483647, %v462_v4 }
 0x129   : > { %v396_v38 = vpop.permute.xlu1 %395 }
 0x12a   : > { %829 = vrcp.f32 %v579_v37  ;;  %v402_v41 = vsub.f32 %v396_v38, %v401_v35  ;;  %v583_v6 = vsub.f32 %v553_v32, %v579_v37  ;;  %v464_v39 = vmul.f32 4.0, %v463_v11 }
 0x12c   : > { %v403_v47 = vand.u32 2147483647, %v402_v41 }
 0x12e   : > { %v408_v51 = vpop.permute.xlu1 %407  ;;  %v404_v52 = vmul.f32 5.0, %v403_v47 }
 0x12f   : > { %v414_v54 = vsub.f32 %v408_v51, %v413_v46 }
 0x130   : > { %v828_v61 = vpop.eup %827  ;;  %v405_v62 = vadd.f32 %v404_v52, %v393_v53 }
 0x131   : > { %v415_v59 = vand.u32 2147483647, %v414_v54  ;;  %v584_v9 = vmul.f32 %v828_v61, %v583_v6 }
 0x133   : > { %v416_v63 = vmul.f32 5.0, %v415_v59  ;;  %v432_v0 = vpop.permute.xlu1 %431 }
 0x134   : > { %v830_v1 = vpop.eup %829  ;;  %v438_v2 = vsub.f32 %v432_v0, %v437_v56 }
 0x135   : > { %v582_v5 = vmul.f32 %v830_v1, %v552_v34  ;;  %v417_v7 = vadd.f32 %v416_v63, %v405_v62 }
 0x136   : > { %v439_v42 = vand.u32 2147483647, %v438_v2 }
 0x137   : > { %v429_v12 = vadd.f32 %v428_v8, %v417_v7  ;;  %v585_v15 = vsub.f32 %v582_v5, %v584_v9 }
 0x138   : > { %v444_v10 = vpop.permute.xlu1 %443  ;;  %v440_v13 = vmul.f32 5.0, %v439_v42 }
 0x139   : > { %v450_v14 = vsub.f32 %v444_v10, %v449_v3  ;;  %v586_v19 = vsub.f32 0.0, %v585_v15 }
 0x13a   : > { %v441_v17 = vadd.f32 %v440_v13, %v429_v12 }
 0x13b   : > { %v451_v16 = vand.u32 2147483647, %v450_v14  ;;  %v587_v22 = vmul.f32 2.0, %v586_v19 }
 0x13d   : > { %v452_v18 = vmul.f32 5.0, %v451_v16 }
 0x13f   : > { %v453_v20 = vadd.f32 %v452_v18, %v441_v17 }
 0x141   : > { %v465_v21 = vadd.f32 %v464_v39, %v453_v20 }
 0x143   : > { %v588_v23 = vadd.f32 %v587_v22, %v465_v21 }
 0x145   : > { %589 = vst [vmem:[%s257_s7] sm:$0xff] %v588_v23 }
 0x146   : > { %844 = shalt.err (!%p841_p5)
}
 0x147   : > { %s845_s22 = scalar_lea.hbm %s1073_s11, 128  ;;  %s849_s29 = scalar_lea.hbm %s1124_s4, 256 }
 0x148   : > { %p846_p6 = scmp.ne.s32.totalorder %s1073_s11, %s845_s22  ;;  %p850_p10 = scmp.lt.u32.totalorder %s1073_s11, %s1124_s4 }
 0x149   : > { %p851_p11 = scmp.lt.u32.totalorder %s849_s29, %s845_s22  ;;  %p853_p13 = scmp.lt.u32.totalorder %s845_s22, %s1073_s11 }
 0x14a   : > { %p847_p7 = pnand %p846_p6, %p989_p4 }
 0x14b   : > { %p852_p12 = por %p851_p11, %p850_p10 }
 0x14c   : > { %p848_p9 = pneg %p847_p7 }
 0x14d   : > { %p854_p0 = por %p853_p13, %p852_p12 }
 0x14f   : > { %p855_p1 = pnand %p854_p0, %p848_p9 }
 0x151   : > { %858 = shalt.err (!%p855_p1)
}
 0x152   : > { %738 = dma.vmem_to_hbm [thread:$0]  (%p989_p4), %s1075_s8, 128, %s1073_s11, %s591_s12  }
 0x153 PF: > { %p744_p2 = scmp.ge.s32.totalorder %s909_s20, 2  ;;  %s617_s6 = sand.u32 1, %s889_s15  }
 0x154   : > { %s618_s7 = scalar_lea.sflag [#allocation3], %s617_s6 }
 0x155   : > { %p741_p3 = pnand %p744_p2, %p996_p8 }
 0x157   : > { %884 = dma.done.wait (!%p741_p3), %s618_s7, 128  }
 0x158   : > { %886 = vsyncadd (!%p741_p3), %s618_s7, 4294967168  ;;  %s17_s20 = sadd.s32 1, %s909_s20   ;;  %s1127_s15 = smov %s893_s16 }
 0x159   : > { %p14_p5 = scmp.ge.s32.totalorder %s17_s20, 4   ;;  %s1128_s16 = smov %s897_s17 }
 0x15a   : > { %s1129_s17 = smov %s1002_s28  ;;  %s1130_s18 = smov %s905_s19 }
 0x15b   : > { %s1131_s19 = smov %s1133_s23  ;;  %16 = sbr.rel (!%p14_p5) target bundleno = 4 (0x4), region = 80 }
 0x162   :  { %623 = vsyncpa [#allocation3], 1 }
 0x163   :  { %625 = vsyncpa [#allocation3 + $0x1], 1 }

</bundles_post_ra>
